<compile_context>
chip_gen: v5e
topology: v5e:2x2
jax: 0.10.0
libtpu: 0.0.40
codegen_flags: <defaults>
</compile_context>

<pallas_src>
import jax
import jax.numpy as jnp
from jax.experimental import pallas as pl
from jax.experimental.pallas import tpu as pltpu

EPS = 1e-5

_VMEM_BUDGET_BYTES = 32 * 1024 * 1024      # per-step working-set budget (v7x headroom)
_TARGET_BLOCK_BYTES = 4 * 1024 * 1024      # per-input block size that amortizes step overhead
_VMEM_LIMIT_BYTES = 48 * 1024 * 1024       # raise scoped VMEM limit (<= v7x 64 MiB physical)


def _add_bn_kernel(x1_ref, x2_ref, gamma_ref, beta_ref, o_ref):
    """One E-tile, all N rows. Refs: x1/x2/out (N, Et) native dtype, gamma/beta (1, Et)."""
    # Add in f32 (inputs may be bf16); single sweep builds sum and sum-of-squares.
    added = x1_ref[...].astype(jnp.float32) + x2_ref[...].astype(jnp.float32)  # (N, Et)
    n_rows = added.shape[0]
    inv_n = 1.0 / n_rows

    s = jnp.sum(added, axis=0, keepdims=True)            # (1, Et)
    ss = jnp.sum(added * added, axis=0, keepdims=True)   # (1, Et)

    mean = s * inv_n
    var = jnp.maximum(ss * inv_n - mean * mean, 0.0)     # biased variance (BatchNorm1d training)
    inv_std = jax.lax.rsqrt(var + EPS)

    # Fold the affine into per-feature scale/shift: 2 VALU ops/element on the store path.
    gamma = gamma_ref[...].astype(jnp.float32)
    beta = beta_ref[...].astype(jnp.float32)
    scale = inv_std * gamma                              # (1, Et)
    shift = beta - mean * scale                          # (1, Et)

    o_ref[...] = (added * scale + shift).astype(o_ref.dtype)


def _choose_e_tile(E, N, itemsize):
    """Pick an E-tile: lane-dense (multiple of 128), divides E, fits VMEM, big enough
    to amortize per-step overhead but small enough to keep multiple grid steps when
    the problem is large (DMA/compute overlap + megacore split)."""
    if E % 128 != 0:
        return E  # full-E block: last block dim equals the array dim -> always legal

    candidates = [et for et in range(128, E + 1, 128) if E % et == 0]
    # per-step working set: 2 inputs + 1 output, double-buffered, native dtype,
    # plus the f32 `added` working copy.
    fits = [et for et in candidates if N * et * (6 * itemsize + 8) <= _VMEM_BUDGET_BYTES]
    if not fits:
        # TODO(synk): two-pass N-tiled stats kernel needed for this regime.
        return 128
    for et in fits:
        if N * et * itemsize >= _TARGET_BLOCK_BYTES:
            return et
    return fits[-1]


def add_and_normalize(input1, input2, gamma, beta, *, e_tile=None):
    """input1, input2: (B, P, E), same dtype. gamma, beta: (E,). Returns (B, P, E)
    in the input dtype."""
    B, P, E = input1.shape
    N = B * P
    out_dtype = input1.dtype

    x1 = input1.reshape(N, E)
    x2 = input2.reshape(N, E)
    g = gamma.reshape(1, E)
    b = beta.reshape(1, E)

    if e_tile is None:
        e_tile = _choose_e_tile(E, N, jnp.dtype(out_dtype).itemsize)
    assert E % e_tile == 0, "e_tile must divide E"
    assert e_tile == E or e_tile % 128 == 0, "e_tile must be lane-dense or the full E"
    num_e_tiles = E // e_tile

    out = pl.pallas_call(
        _add_bn_kernel,
        out_shape=jax.ShapeDtypeStruct((N, E), out_dtype),
        grid_spec=pltpu.PrefetchScalarGridSpec(
            num_scalar_prefetch=0,
            grid=(num_e_tiles,),
            in_specs=[
                pl.BlockSpec((N, e_tile), lambda i: (0, i)),
                pl.BlockSpec((N, e_tile), lambda i: (0, i)),
                pl.BlockSpec((1, e_tile), lambda i: (0, i)),
                pl.BlockSpec((1, e_tile), lambda i: (0, i)),
            ],
            out_specs=pl.BlockSpec((N, e_tile), lambda i: (0, i)),
        ),
        compiler_params=pltpu.CompilerParams(
            dimension_semantics=("parallel",),   # E-tiles are fully independent
            vmem_limit_bytes=_VMEM_LIMIT_BYTES,
        ),
    )(x1, x2, g, b)

    return out.reshape(B, P, E)


def _reference(input1, input2, gamma, beta):
    """Plain-JAX training-mode BatchNorm1d forward (biased var), f32."""
    B, P, E = input1.shape
    added = (input1.astype(jnp.float32) + input2.astype(jnp.float32)).reshape(B * P, E)
    mean = added.mean(axis=0, keepdims=True)
    var = ((added - mean) ** 2).mean(axis=0, keepdims=True)
    out = (added - mean) / jnp.sqrt(var + EPS) * gamma.astype(jnp.float32) \
          + beta.astype(jnp.float32)
    return out.reshape(B, P, E)


if __name__ == "__main__":
    # Small shapes consistent with the module's forward: (batch, problem, embedding_dim)
    B, P, E = 4, 24, 256

    key = jax.random.PRNGKey(0)
    k1, k2, k3, k4 = jax.random.split(key, 4)
    input1 = jax.random.normal(k1, (B, P, E), dtype=jnp.float32)
    input2 = jax.random.normal(k2, (B, P, E), dtype=jnp.float32)
    gamma = 1.0 + 0.1 * jax.random.normal(k3, (E,), dtype=jnp.float32)
    beta = 0.1 * jax.random.normal(k4, (E,), dtype=jnp.float32)

    ref = _reference(input1, input2, gamma, beta)

    # 1) f32 path, auto tile selection.
    out = jax.block_until_ready(add_and_normalize(input1, input2, gamma, beta))
    assert out.shape == (B, P, E) and out.dtype == jnp.float32
    assert jnp.allclose(out, ref, atol=1e-4, rtol=1e-4)

    # 2) Explicit 128-wide E tiles -> multi-step "parallel" grid (pipelined / megacore path).
    out_t = jax.block_until_ready(add_and_normalize(input1, input2, gamma, beta, e_tile=128))
    assert jnp.allclose(out_t, ref, atol=1e-4, rtol=1e-4)

    # 3) bf16 I/O: streamed in native dtype, f32 statistics inside the kernel.
    x1b = input1.astype(jnp.bfloat16)
    x2b = input2.astype(jnp.bfloat16)
    out_b = jax.block_until_ready(add_and_normalize(x1b, x2b, gamma, beta))
    assert out_b.dtype == jnp.bfloat16
    ref_b = _reference(x1b, x2b, gamma, beta)
    assert jnp.allclose(out_b.astype(jnp.float32), ref_b, atol=5e-2, rtol=5e-2)

    # 4) Small-E fallback (E not a multiple of 128 -> single full-E block).
    Es = 32
    x1s = jax.random.normal(k1, (2, 8, Es), dtype=jnp.float32)
    x2s = jax.random.normal(k2, (2, 8, Es), dtype=jnp.float32)
    out_s = jax.block_until_ready(
        add_and_normalize(x1s, x2s, jnp.ones((Es,), jnp.float32), jnp.zeros((Es,), jnp.float32)))
    ref_s = _reference(x1s, x2s, jnp.ones((Es,), jnp.float32), jnp.zeros((Es,), jnp.float32))
    assert jnp.allclose(out_s, ref_s, atol=1e-4, rtol=1e-4)

    print("KERNEL_OK")
</pallas_src>

<mosaic_0001>
module attributes {stable_mosaic.version = 11 : i64} {
  func.func @_add_bn_kernel(%arg0: i32, %arg1: memref<96x256xf32, #tpu.memory_space<vmem>>, %arg2: memref<96x256xf32, #tpu.memory_space<vmem>>, %arg3: memref<1x256xf32, #tpu.memory_space<vmem>>, %arg4: memref<1x256xf32, #tpu.memory_space<vmem>>, %arg5: memref<96x256xf32, #tpu.memory_space<vmem>>) attributes {dimension_semantics = [#tpu.dimension_semantics<parallel>], iteration_bounds = array<i64: 1>, scalar_prefetch = 0 : i64, scratch_operands = 0 : i64, tpu.core_type = #tpu.core_type<tc>, window_params = [{transform_indices = @transform_0, window_bounds = array<i64: 96, 256>}, {transform_indices = @transform_1, window_bounds = array<i64: 96, 256>}, {transform_indices = @transform_2, window_bounds = array<i64: 1, 256>}, {transform_indices = @transform_3, window_bounds = array<i64: 1, 256>}, {transform_indices = @transform_4, window_bounds = array<i64: 96, 256>}]} {
    %c0 = arith.constant 0 : index
    %c0_0 = arith.constant 0 : index
    %0 = vector.load %arg1[%c0, %c0_0] : memref<96x256xf32, #tpu.memory_space<vmem>>, vector<96x256xf32>
    %c0_1 = arith.constant 0 : index
    %c0_2 = arith.constant 0 : index
    %1 = vector.load %arg2[%c0_1, %c0_2] : memref<96x256xf32, #tpu.memory_space<vmem>>, vector<96x256xf32>
    %2 = arith.addf %0, %1 : vector<96x256xf32>
    %cst = arith.constant dense<0.000000e+00> : vector<256xf32>
    %3 = vector.multi_reduction <add>, %2, %cst [0] : vector<96x256xf32> to vector<256xf32>
    %4 = vector.shape_cast %3 : vector<256xf32> to vector<1x256xf32>
    %5 = arith.mulf %2, %2 : vector<96x256xf32>
    %cst_3 = arith.constant dense<0.000000e+00> : vector<256xf32>
    %6 = vector.multi_reduction <add>, %5, %cst_3 [0] : vector<96x256xf32> to vector<256xf32>
    %7 = vector.shape_cast %6 : vector<256xf32> to vector<1x256xf32>
    %cst_4 = arith.constant 0.010416667 : f32
    %8 = vector.broadcast %cst_4 : f32 to vector<1x256xf32>
    %9 = arith.mulf %4, %8 : vector<1x256xf32>
    %cst_5 = arith.constant 0.010416667 : f32
    %10 = vector.broadcast %cst_5 : f32 to vector<1x256xf32>
    %11 = arith.mulf %7, %10 : vector<1x256xf32>
    %12 = arith.mulf %9, %9 : vector<1x256xf32>
    %13 = arith.subf %11, %12 : vector<1x256xf32>
    %cst_6 = arith.constant 0.000000e+00 : f32
    %14 = vector.broadcast %cst_6 : f32 to vector<1x256xf32>
    %15 = arith.maximumf %13, %14 : vector<1x256xf32>
    %cst_7 = arith.constant 9.99999974E-6 : f32
    %16 = vector.broadcast %cst_7 : f32 to vector<1x256xf32>
    %17 = arith.addf %15, %16 : vector<1x256xf32>
    %18 = math.rsqrt %17 : vector<1x256xf32>
    %c0_8 = arith.constant 0 : index
    %c0_9 = arith.constant 0 : index
    %19 = vector.load %arg3[%c0_8, %c0_9] : memref<1x256xf32, #tpu.memory_space<vmem>>, vector<1x256xf32>
    %c0_10 = arith.constant 0 : index
    %c0_11 = arith.constant 0 : index
    %20 = vector.load %arg4[%c0_10, %c0_11] : memref<1x256xf32, #tpu.memory_space<vmem>>, vector<1x256xf32>
    %21 = arith.mulf %18, %19 : vector<1x256xf32>
    %22 = arith.mulf %9, %21 : vector<1x256xf32>
    %23 = arith.subf %20, %22 : vector<1x256xf32>
    %24 = vector.broadcast %21 : vector<1x256xf32> to vector<96x256xf32>
    %25 = arith.mulf %2, %24 : vector<96x256xf32>
    %26 = vector.broadcast %23 : vector<1x256xf32> to vector<96x256xf32>
    %27 = arith.addf %25, %26 : vector<96x256xf32>
    %c0_12 = arith.constant 0 : index
    %c0_13 = arith.constant 0 : index
    %28 = vector.load %arg5[%c0_12, %c0_13] : memref<96x256xf32, #tpu.memory_space<vmem>>, vector<96x256xf32>
    tpu.vector_store %arg5[%c0_12, %c0_13], %27 {strides = array<i32>} : memref<96x256xf32, #tpu.memory_space<vmem>>, vector<96x256xf32>,
    return
  }
  func.func @transform_0(%arg0: i32) -> (i32, i32) {
    %c0_i32 = arith.constant 0 : i32
    %c0_i32_0 = arith.constant 0 : i32
    return %c0_i32, %arg0 : i32, i32
  }
  func.func @transform_1(%arg0: i32) -> (i32, i32) {
    %c0_i32 = arith.constant 0 : i32
    %c0_i32_0 = arith.constant 0 : i32
    return %c0_i32, %arg0 : i32, i32
  }
  func.func @transform_2(%arg0: i32) -> (i32, i32) {
    %c0_i32 = arith.constant 0 : i32
    %c0_i32_0 = arith.constant 0 : i32
    return %c0_i32, %arg0 : i32, i32
  }
  func.func @transform_3(%arg0: i32) -> (i32, i32) {
    %c0_i32 = arith.constant 0 : i32
    %c0_i32_0 = arith.constant 0 : i32
    return %c0_i32, %arg0 : i32, i32
  }
  func.func @transform_4(%arg0: i32) -> (i32, i32) {
    %c0_i32 = arith.constant 0 : i32
    %c0_i32_0 = arith.constant 0 : i32
    return %c0_i32, %arg0 : i32, i32
  }
}

</mosaic_0001>

<bundles_post_ra>
// kernel: tpu_custom_call.1
= control target key start
LH: loop header
LB: loop body
LE: loop exit
PB: predicated region body
PF: predicated region fallthrough
CT: control target
= control target key end

     0   :  { %9 = vsyncpa [#allocation3], 0  ;;  %s743_s0 = inlined_call_operand.hbm [shape: f32[96,256], index: 0, kind: input, shape index: {}]   ;;  %s744_s1 = inlined_call_operand.hbm [shape: f32[96,256], index: 1, kind: input, shape index: {}]   ;;  %s745_s2 = inlined_call_operand.hbm [shape: f32[1,256], index: 2, kind: input, shape index: {}]   ;;  %s746_s3 = inlined_call_operand.vmem [shape: f32[1,256], index: 3, kind: input, shape index: {}]   ;;  %s747_s4 = inlined_call_operand.hbm [shape: f32[96,256], index: 4, kind: output, shape index: {}]  }
   0x1   :  { %10 = vsyncpa [#allocation6], 0 }
   0x2   :  { %11 = vsyncpa [#allocation4], 0  ;;  %s29_s17 = sshll.u32 %s744_s1, 4  ;;  %s488_s18 = smov [#allocation5]   ;;  %s30_s17 = int_to_ptr.hbm [resolvable:$true] %s29_s17 }
   0x3   :  { %s31_s19 = sshll.u32 %s488_s18, 4  ;;  %s16_s22 = sshll.u32 %s743_s0, 4  ;;  %s32_s19 = int_to_ptr.vmem [resolvable:$true] %s31_s19  ;;  %s17_s22 = int_to_ptr.hbm [resolvable:$true] %s16_s22 }
   0x4   :  { %s489_s23 = smov 256   ;;  %s490_s24 = smov 16  }
   0x5   :  { %37 = dma.hbm_to_vmem [thread:$0]  %s30_s17, 3072, %s32_s19, [#allocation6], %s489_s23, %s489_s23, %s490_s24  }
   0x6   :  { %s491_s25 = smov [#allocation2]   ;;  %s43_s1 = sshll.u32 %s745_s2, 4  ;;  %s44_s1 = int_to_ptr.hbm [resolvable:$true] %s43_s1 }
   0x7   :  { %s18_s26 = sshll.u32 %s491_s25, 4  ;;  %s492_s0 = smov [#allocation7]   ;;  %s19_s26 = int_to_ptr.vmem [resolvable:$true] %s18_s26 }
   0x8   :  { %24 = dma.hbm_to_vmem [thread:$0]  %s17_s22, 3072, %s19_s26, [#allocation3], %s489_s23, %s489_s23, %s490_s24  }
   0x9   :  { %s45_s29 = sshll.u32 %s492_s0, 4  ;;  %s46_s29 = int_to_ptr.vmem [resolvable:$true] %s45_s29 }
   0xa   :  { %48 = dma.hbm_to_vmem [thread:$0]  %s44_s1, 32, %s46_s29, [#allocation6]  }
   0xb   :  { %482 = dma.done.wait [#allocation3], 3072  }
   0xc   :  { %483 = vsyncadd [#allocation3], 4294964224 }
   0xd   :  { %484 = dma.done.wait [#allocation6], 3104  }
   0xe   :  { %485 = vsyncadd [#allocation6], 4294964192  ;;  %v63_v0 = vld [vmem:[#allocation2] sm:$0xff]  ;;  %v64_v1 = vld [vmem:[#allocation2 + $0x8] sm:$0xff]  ;;  %vm273_vm6 = vcmask 1040384   ;;  %s362_s8 = sshll.u32 %s747_s4, 4  ;;  %s363_s8 = int_to_ptr.hbm [resolvable:$true] %s362_s8 }
   0xf   :  { %v65_v2 = vld [vmem:[#allocation2 + $0x10] sm:$0xff]  ;;  %v66_v3 = vld [vmem:[#allocation2 + $0x18] sm:$0xff]  ;;  %v67_v4 = vld [vmem:[#allocation2 + $0x20] sm:$0xff] }
  0x10   :  { %v68_v5 = vld [vmem:[#allocation2 + $0x28] sm:$0xff]  ;;  %v69_v6 = vld [vmem:[#allocation2 + $0x30] sm:$0xff]  ;;  %v70_v7 = vld [vmem:[#allocation2 + $0x38] sm:$0xff] }
  0x11   :  { %v71_v8 = vld [vmem:[#allocation2 + $0x40] sm:$0xff]  ;;  %v88_v10 = vld [vmem:[#allocation5 + $0x8] sm:$0xff]  ;;  %v89_v11 = vld [vmem:[#allocation5 + $0x10] sm:$0xff] }
  0x12   :  { %v87_v9 = vld [vmem:[#allocation5] sm:$0xff]  ;;  %v90_v12 = vld [vmem:[#allocation5 + $0x18] sm:$0xff]  ;;  %v92_v14 = vld [vmem:[#allocation5 + $0x28] sm:$0xff]  ;;  %v536_v16 = vadd.f32 %v88_v10, %v64_v1  ;;  %v538_v17 = vadd.f32 %v89_v11, %v65_v2 }
  0x13   :  { %v91_v13 = vld [vmem:[#allocation5 + $0x20] sm:$0xff]  ;;  %v534_v15 = vadd.f32 %v87_v9, %v63_v0  ;;  %v93_v18 = vld [vmem:[#allocation5 + $0x30] sm:$0xff]  ;;  %v94_v19 = vld [vmem:[#allocation5 + $0x38] sm:$0xff]  ;;  %v540_v21 = vadd.f32 %v90_v12, %v66_v3  ;;  %v544_v23 = vadd.f32 %v92_v14, %v68_v5 }
  0x14   :  { %v95_v20 = vld [vmem:[#allocation5 + $0x40] sm:$0xff]  ;;  %v542_v22 = vadd.f32 %v91_v13, %v67_v4  ;;  %v72_v24 = vld [vmem:[#allocation2 + $0x48] sm:$0xff]  ;;  %v546_v26 = vadd.f32 %v93_v18, %v69_v6  ;;  %v73_v28 = vld [vmem:[#allocation2 + $0x50] sm:$0xff]  ;;  %v550_v30 = vadd.f32 %v94_v19, %v70_v7  ;;  %v170_v7 = vmul.f32 %v536_v16, %v536_v16 }
  0x15   :  { %v96_v25 = vld [vmem:[#allocation5 + $0x48] sm:$0xff]  ;;  %v135_v27 = vadd.f32 %v538_v17, %v534_v15  ;;  %v97_v29 = vld [vmem:[#allocation5 + $0x50] sm:$0xff]  ;;  %v152_v31 = vadd.f32 %v540_v21, %v536_v16  ;;  %v74_v32 = vld [vmem:[#allocation2 + $0x58] sm:$0xff]  ;;  %v554_v34 = vadd.f32 %v95_v20, %v71_v8  ;;  %v169_v2 = vmul.f32 %v534_v15, %v534_v15 }
  0x16   :  { %v98_v33 = vld [vmem:[#allocation5 + $0x58] sm:$0xff]  ;;  %v75_v36 = vld [vmem:[#allocation2 + $0x60] sm:$0xff]  ;;  %v557_v38 = vadd.f32 %v96_v25, %v72_v24  ;;  %v76_v40 = vld [vmem:[#allocation2 + $0x68] sm:$0xff]  ;;  %v560_v42 = vadd.f32 %v97_v29, %v73_v28  ;;  %v171_v8 = vmul.f32 %v538_v17, %v538_v17  ;;  %v172_v9 = vmul.f32 %v540_v21, %v540_v21 }
  0x17   :  { %v136_v35 = vadd.f32 %v135_v27, %v542_v22  ;;  %v99_v37 = vld [vmem:[#allocation5 + $0x60] sm:$0xff]  ;;  %v153_v39 = vadd.f32 %v152_v31, %v544_v23  ;;  %v100_v41 = vld [vmem:[#allocation5 + $0x68] sm:$0xff]  ;;  %v77_v44 = vld [vmem:[#allocation2 + $0x70] sm:$0xff]  ;;  %v563_v47 = vadd.f32 %v98_v33, %v74_v32  ;;  %v173_v24 = vmul.f32 %v542_v22, %v542_v22 }
  0x18   :  { %v78_v45 = vld [vmem:[#allocation2 + $0x78] sm:$0xff]  ;;  %v101_v46 = vld [vmem:[#allocation5 + $0x70] sm:$0xff]  ;;  %v79_v49 = vld [vmem:[#allocation2 + $0x80] sm:$0xff]  ;;  %v566_v52 = vadd.f32 %v99_v37, %v75_v36  ;;  %v569_v54 = vadd.f32 %v100_v41, %v76_v40  ;;  %v174_v25 = vmul.f32 %v544_v23, %v544_v23  ;;  %v175_v31 = vmul.f32 %v546_v26, %v546_v26 }
  0x19   :  { %v137_v43 = vadd.f32 %v136_v35, %v546_v26  ;;  %v154_v48 = vadd.f32 %v153_v39, %v550_v30  ;;  %v102_v50 = vld [vmem:[#allocation5 + $0x78] sm:$0xff]  ;;  %v103_v51 = vld [vmem:[#allocation5 + $0x80] sm:$0xff]  ;;  %v80_v56 = vld [vmem:[#allocation2 + $0x88] sm:$0xff]  ;;  %v572_v58 = vadd.f32 %v101_v46, %v77_v44  ;;  %v176_v36 = vmul.f32 %v550_v30, %v550_v30 }
  0x1a   :  { %v104_v57 = vld [vmem:[#allocation5 + $0x88] sm:$0xff]  ;;  %v81_v60 = vld [vmem:[#allocation2 + $0x90] sm:$0xff]  ;;  %v82_v61 = vld [vmem:[#allocation2 + $0x98] sm:$0xff]  ;;  %v575_v63 = vadd.f32 %v102_v50, %v78_v45  ;;  %v577_v0 = vadd.f32 %v103_v51, %v79_v49  ;;  %v193_v37 = vadd.f32 %v171_v8, %v169_v2  ;;  %v210_v39 = vadd.f32 %v172_v9, %v170_v7 }
  0x1b   :  { %v138_v53 = vadd.f32 %v137_v43, %v554_v34  ;;  %v155_v55 = vadd.f32 %v154_v48, %v557_v38  ;;  %v105_v62 = vld [vmem:[#allocation5 + $0x90] sm:$0xff]  ;;  %v83_v3 = vld [vmem:[#allocation2 + $0xa0] sm:$0xff]  ;;  %v106_v4 = vld [vmem:[#allocation5 + $0x98] sm:$0xff]  ;;  %v589_v11 = vadd.f32 %v104_v57, %v80_v56  ;;  %v177_v44 = vmul.f32 %v554_v34, %v554_v34 }
  0x1c   :  { %v107_v5 = vld [vmem:[#allocation5 + $0xa0] sm:$0xff]  ;;  %v84_v10 = vld [vmem:[#allocation2 + $0xa8] sm:$0xff]  ;;  %v85_v13 = vld [vmem:[#allocation2 + $0xb0] sm:$0xff]  ;;  %v592_v19 = vadd.f32 %v105_v62, %v81_v60  ;;  %v599_v27 = vadd.f32 %v106_v4, %v82_v61  ;;  %v178_v46 = vmul.f32 %v557_v38, %v557_v38  ;;  %v194_v48 = vadd.f32 %v193_v37, %v173_v24 }
  0x1d   :  { %v139_v59 = vadd.f32 %v138_v53, %v560_v42  ;;  %v156_v1 = vadd.f32 %v155_v55, %v563_v47  ;;  %v108_v14 = vld [vmem:[#allocation5 + $0xa8] sm:$0xff]  ;;  %v109_v18 = vld [vmem:[#allocation5 + $0xb0] sm:$0xff]  ;;  %v601_v28 = vadd.f32 %v107_v5, %v83_v3  ;;  %v86_v32 = vld [vmem:[#allocation2 + $0xb8] sm:$0xff]  ;;  %v211_v49 = vadd.f32 %v210_v39, %v174_v25 }
  0x1e   :  { %v110_v33 = vld [vmem:[#allocation5 + $0xb8] sm:$0xff]  ;;  %v609_v40 = vadd.f32 %v108_v14, %v84_v10  ;;  %v611_v41 = vadd.f32 %v109_v18, %v85_v13  ;;  %v179_v53 = vmul.f32 %v560_v42, %v560_v42  ;;  %v180_v56 = vmul.f32 %v563_v47, %v563_v47 }
  0x1f   :  { %v140_v6 = vadd.f32 %v139_v59, %v566_v52  ;;  %v157_v12 = vadd.f32 %v156_v1, %v569_v54  ;;  %v619_v50 = vadd.f32 %v110_v33, %v86_v32  ;;  %v195_v57 = vadd.f32 %v194_v48, %v175_v31 }
  0x20   :  { %v212_v59 = vadd.f32 %v211_v49, %v176_v36  ;;  %v181_v61 = vmul.f32 %v566_v52, %v566_v52  ;;  %v182_v1 = vmul.f32 %v569_v54, %v569_v54  ;;  %v183_v5 = vmul.f32 %v572_v58, %v572_v58 }
  0x21   :  { %v141_v20 = vadd.f32 %v140_v6, %v572_v58  ;;  %v158_v29 = vadd.f32 %v157_v12, %v575_v63  ;;  %v196_v2 = vadd.f32 %v195_v57, %v177_v44  ;;  %v184_v7 = vmul.f32 %v575_v63, %v575_v63 }
  0x22   :  { %v213_v3 = vadd.f32 %v212_v59, %v178_v46  ;;  %v185_v12 = vmul.f32 %v577_v0, %v577_v0  ;;  %v186_v14 = vmul.f32 %v589_v11, %v589_v11  ;;  %v187_v25 = vmul.f32 %v592_v19, %v592_v19 }
  0x23   :  { %v142_v35 = vadd.f32 %v141_v20, %v577_v0  ;;  %v159_v43 = vadd.f32 %v158_v29, %v589_v11  ;;  %v197_v8 = vadd.f32 %v196_v2, %v179_v53  ;;  %v188_v31 = vmul.f32 %v599_v27, %v599_v27 }
  0x24   :  { %v214_v9 = vadd.f32 %v213_v3, %v180_v56  ;;  %v189_v36 = vmul.f32 %v601_v28, %v601_v28  ;;  %v190_v37 = vmul.f32 %v609_v40, %v609_v40  ;;  %v191_v44 = vmul.f32 %v611_v41, %v611_v41 }
  0x25   :  { %v143_v45 = vadd.f32 %v142_v35, %v592_v19  ;;  %v160_v51 = vadd.f32 %v159_v43, %v599_v27  ;;  %v198_v18 = vadd.f32 %v197_v8, %v181_v61 }
  0x26   :  { %v215_v20 = vadd.f32 %v214_v9, %v182_v1 }
  0x27   :  { %v144_v55 = vadd.f32 %v143_v45, %v601_v28  ;;  %v161_v60 = vadd.f32 %v160_v51, %v609_v40  ;;  %v199_v32 = vadd.f32 %v198_v18, %v183_v5  ;;  %v192_v45 = vmul.f32 %v619_v50, %v619_v50 }
  0x28   :  { %v216_v33 = vadd.f32 %v215_v20, %v184_v7 }
  0x29   :  { %v145_v62 = vadd.f32 %v144_v55, %v611_v41  ;;  %v162_v4 = vadd.f32 %v161_v60, %v619_v50  ;;  %v200_v39 = vadd.f32 %v199_v32, %v185_v12 }
  0x2a   :  { %v217_v43 = vadd.f32 %v216_v33, %v186_v14 }
  0x2b   :  { %v146_v6 = vrot.slane %v145_v62, 4  ;;  %v163_v10 = vrot.slane %v162_v4, 4  ;;  %v201_v49 = vadd.f32 %v200_v39, %v187_v25 }
  0x2c   :  { %v218_v51 = vadd.f32 %v217_v43, %v188_v31 }
  0x2d   :  { %v147_v13 = vadd.f32 %v146_v6, %v145_v62  ;;  %v164_v24 = vadd.f32 %v163_v10, %v162_v4  ;;  %v202_v53 = vadd.f32 %v201_v49, %v189_v36 }
  0x2e   :  { %v219_v55 = vadd.f32 %v218_v51, %v190_v37 }
  0x2f   :  { %v148_v29 = vrot.slane %v147_v13, 2  ;;  %v165_v35 = vrot.slane %v164_v24, 2  ;;  %v203_v59 = vadd.f32 %v202_v53, %v191_v44  ;;  %v259_v53 = vld [vmem:[#allocation7] sm:$0x3] }
  0x30   :  { %v220_v60 = vadd.f32 %v219_v55, %v192_v45 }
  0x31   :  { %v149_v46 = vadd.f32 %v148_v29, %v147_v13  ;;  %v166_v48 = vadd.f32 %v165_v35, %v164_v24  ;;  %v204_v61 = vrot.slane %v203_v59, 4 }
  0x32   :  { %v221_v62 = vrot.slane %v220_v60, 4 }
  0x33   :  { %v150_v56 = vrot.slane %v149_v46, 1  ;;  %v167_v57 = vrot.slane %v166_v48, 1  ;;  %v205_v3 = vadd.f32 %v204_v61, %v203_v59 }
  0x34   :  { %v222_v4 = vadd.f32 %v221_v62, %v220_v60  ;;  %v263_v60 = vperm.slane %v259_v53, 1 }
  0x35   :  { %v151_v1 = vadd.f32 %v150_v56, %v149_v46  ;;  %v168_v2 = vadd.f32 %v167_v57, %v166_v48  ;;  %v206_v5 = vrot.slane %v205_v3, 2  ;;  %v262_v57 = vperm.slane %v259_v53, 0 }
  0x36   :  { %v223_v6 = vrot.slane %v222_v4, 2 }
  0x37   :  { %v207_v7 = vadd.f32 %v206_v5, %v205_v3  ;;  %v227_v9 = vmul.f32 0.010416667, %v151_v1  ;;  %v228_v10 = vmul.f32 0.010416667, %v168_v2 }
  0x38   :  { %v224_v8 = vadd.f32 %v223_v6, %v222_v4 }
  0x39   :  { %v208_v12 = vrot.slane %v207_v7, 1  ;;  %v231_v20 = vmul.f32 %v227_v9, %v227_v9  ;;  %v232_v24 = vmul.f32 %v228_v10, %v228_v10 }
  0x3a   :  { %v225_v13 = vrot.slane %v224_v8, 1 }
  0x3b   :  { %v209_v14 = vadd.f32 %v208_v12, %v207_v7 }
  0x3c   :  { %v226_v18 = vadd.f32 %v225_v13, %v224_v8  ;;  %v260_v8 = vld [vmem:[%s746_s3] sm:$0x3]  ;;  %s493_s3 = smov [#allocation8]  }
  0x3d   :  { %v229_v25 = vmul.f32 0.010416667, %v209_v14  ;;  %s360_s5 = sshll.u32 %s493_s3, 4  ;;  %s361_s5 = int_to_ptr.vmem [resolvable:$true] %s360_s5 }
  0x3e   :  { %v230_v29 = vmul.f32 0.010416667, %v226_v18 }
  0x3f   :  { %v233_v31 = vsub.f32 %v229_v25, %v231_v20 }
  0x40   :  { %v234_v32 = vsub.f32 %v230_v29, %v232_v24 }
  0x41   :  { %v235_v33 = vmax.f32 %v233_v31, 0.0 }
  0x42   :  { %v236_v35 = vmax.f32 %v234_v32, 0.0 }
  0x43   :  { %v237_v36 = vadd.f32 1e-05, %v235_v33 }
  0x44   :  { %v238_v37 = vadd.f32 1e-05, %v236_v35 }
  0x45   :  { %382 = vrsqrt.f32 %v237_v36  ;;  %vm245_vm0 = vweird.f32 %v237_v36 }
  0x46   :  { %384 = vrsqrt.f32 %v238_v37  ;;  %vm255_vm2 = vweird.f32 %v238_v37 }
  0x4b   :  { %v383_v39 = vpop.eup %382 }
  0x4c   :  { %v385_v43 = vpop.eup %384  ;;  %v240_v44 = vmul.f32 %v383_v39, %v237_v36  ;;  %vm246_vm1 = vweird.f32 %v383_v39 }
  0x4d   :  { %v250_v45 = vmul.f32 %v385_v43, %v238_v37  ;;  %vm256_vm3 = vweird.f32 %v385_v43  ;;  %vm247_vm4 = vmor %vm245_vm0, %vm246_vm1 }
  0x4e   :  { %v241_v46 = vmul.f32 %v383_v39, %v240_v44  ;;  %vm257_vm5 = vmor %vm255_vm2, %vm256_vm3 }
  0x4f   :  { %v251_v48 = vmul.f32 %v385_v43, %v250_v45 }
  0x50   :  { %v242_v49 = vmul.f32 0.5, %v241_v46 }
  0x51   :  { %v252_v51 = vmul.f32 0.5, %v251_v48 }
  0x52   :  { %v243_v55 = vsub.f32 1.5, %v242_v49 }
  0x53   :  { %v253_v56 = vsub.f32 1.5, %v252_v51 }
  0x54   :  { %v244_v59 = vmul.f32 %v383_v39, %v243_v55 }
  0x55   :  { %v254_v61 = vmul.f32 %v385_v43, %v253_v56 }
  0x56   :  { %v248_v62 = vsel %vm247_vm4, %v383_v39, %v244_v59 }
  0x57   :  { %v258_v1 = vsel %vm257_vm5, %v385_v43, %v254_v61  ;;  %v266_v2 = vmul.f32 %v262_v57, %v248_v62 }
  0x58   :  { %v267_v3 = vmul.f32 %v263_v60, %v258_v1 }
  0x59   :  { %v268_v4 = vmul.f32 %v266_v2, %v227_v9  ;;  %v654_v6 = vperm.slane %v266_v2, 0 }
  0x5a   :  { %v269_v5 = vmul.f32 %v267_v3, %v228_v10  ;;  %v656_v7 = vperm.slane %v267_v3, 0 }
  0x5b   :  { %v279_v18 = vmul.f32 %v654_v6, %v534_v15  ;;  %v281_v9 = vmul.f32 %v654_v6, %v538_v17  ;;  %v283_v29 = vmul.f32 %v654_v6, %v542_v22  ;;  %v285_v17 = vmul.f32 %v654_v6, %v546_v26 }
  0x5c   :  { %v272_v12 = vrot.slane %v269_v5, 7  ;;  %v280_v20 = vmul.f32 %v656_v7, %v536_v16  ;;  %v282_v10 = vmul.f32 %v656_v7, %v540_v21  ;;  %v284_v31 = vmul.f32 %v656_v7, %v544_v23 }
  0x5d   :  { %v286_v33 = vmul.f32 %v656_v7, %v550_v30  ;;  %v287_v23 = vmul.f32 %v654_v6, %v554_v34  ;;  %v288_v36 = vmul.f32 %v656_v7, %v557_v38  ;;  %v289_v37 = vmul.f32 %v654_v6, %v560_v42 }
  0x5e   :  { %v274_v13 = vsel %vm273_vm6, %v268_v4, %v272_v12  ;;  %v290_v39 = vmul.f32 %v656_v7, %v563_v47  ;;  %v291_v43 = vmul.f32 %v654_v6, %v566_v52  ;;  %v292_v44 = vmul.f32 %v656_v7, %v569_v54 }
  0x5f   :  { %v276_v14 = vsub.f32 %v260_v8, %v274_v13  ;;  %v293_v45 = vmul.f32 %v654_v6, %v572_v58  ;;  %v294_v46 = vmul.f32 %v656_v7, %v575_v63  ;;  %v295_v48 = vmul.f32 %v654_v6, %v577_v0 }
  0x60   :  { %v296_v49 = vmul.f32 %v656_v7, %v589_v11  ;;  %v297_v51 = vmul.f32 %v654_v6, %v592_v19  ;;  %v298_v53 = vmul.f32 %v656_v7, %v599_v27  ;;  %v299_v55 = vmul.f32 %v654_v6, %v601_v28 }
  0x61   :  { %v669_v24 = vperm.slane %v276_v14, 0  ;;  %v671_v25 = vperm.slane %v276_v14, 1  ;;  %v300_v56 = vmul.f32 %v656_v7, %v609_v40  ;;  %v301_v57 = vmul.f32 %v654_v6, %v611_v41 }
  0x62   :  { %v302_v59 = vmul.f32 %v656_v7, %v619_v50 }
  0x63   :  { %v308_v15 = vadd.f32 %v669_v24, %v279_v18  ;;  %v309_v16 = vadd.f32 %v671_v25, %v280_v20  ;;  %v310_v32 = vadd.f32 %v669_v24, %v281_v9  ;;  %v311_v21 = vadd.f32 %v671_v25, %v282_v10 }
  0x64   :  { %v312_v22 = vadd.f32 %v669_v24, %v283_v29  ;;  %v313_v35 = vadd.f32 %v671_v25, %v284_v31  ;;  %v314_v26 = vadd.f32 %v669_v24, %v285_v17  ;;  %v315_v30 = vadd.f32 %v671_v25, %v286_v33 }
  0x65   :  { %332 = vst [vmem:[#allocation8] sm:$0xff] %v308_v15  ;;  %v316_v34 = vadd.f32 %v669_v24, %v287_v23  ;;  %v317_v38 = vadd.f32 %v671_v25, %v288_v36  ;;  %v318_v42 = vadd.f32 %v669_v24, %v289_v37  ;;  %v319_v47 = vadd.f32 %v671_v25, %v290_v39 }
  0x66   :  { %333 = vst [vmem:[#allocation8 + $0x8] sm:$0xff] %v309_v16  ;;  %v320_v52 = vadd.f32 %v669_v24, %v291_v43  ;;  %v321_v54 = vadd.f32 %v671_v25, %v292_v44  ;;  %v322_v58 = vadd.f32 %v669_v24, %v293_v45  ;;  %v323_v63 = vadd.f32 %v671_v25, %v294_v46 }
  0x67   :  { %334 = vst [vmem:[#allocation8 + $0x10] sm:$0xff] %v310_v32  ;;  %v324_v0 = vadd.f32 %v669_v24, %v295_v48  ;;  %v325_v11 = vadd.f32 %v671_v25, %v296_v49  ;;  %v326_v19 = vadd.f32 %v669_v24, %v297_v51  ;;  %v327_v27 = vadd.f32 %v671_v25, %v298_v53 }
  0x68   :  { %335 = vst [vmem:[#allocation8 + $0x18] sm:$0xff] %v311_v21  ;;  %v328_v28 = vadd.f32 %v669_v24, %v299_v55  ;;  %v329_v60 = vadd.f32 %v671_v25, %v300_v56  ;;  %v330_v40 = vadd.f32 %v669_v24, %v301_v57  ;;  %v331_v41 = vadd.f32 %v671_v25, %v302_v59 }
  0x69   :  { %336 = vst [vmem:[#allocation8 + $0x20] sm:$0xff] %v312_v22 }
  0x6a   :  { %337 = vst [vmem:[#allocation8 + $0x28] sm:$0xff] %v313_v35 }
  0x6b   :  { %338 = vst [vmem:[#allocation8 + $0x30] sm:$0xff] %v314_v26 }
  0x6c   :  { %339 = vst [vmem:[#allocation8 + $0x38] sm:$0xff] %v315_v30 }
  0x6d   :  { %340 = vst [vmem:[#allocation8 + $0x40] sm:$0xff] %v316_v34 }
  0x6e   :  { %341 = vst [vmem:[#allocation8 + $0x48] sm:$0xff] %v317_v38 }
  0x6f   :  { %342 = vst [vmem:[#allocation8 + $0x50] sm:$0xff] %v318_v42 }
  0x70   :  { %343 = vst [vmem:[#allocation8 + $0x58] sm:$0xff] %v319_v47 }
  0x71   :  { %344 = vst [vmem:[#allocation8 + $0x60] sm:$0xff] %v320_v52 }
  0x72   :  { %345 = vst [vmem:[#allocation8 + $0x68] sm:$0xff] %v321_v54 }
  0x73   :  { %346 = vst [vmem:[#allocation8 + $0x70] sm:$0xff] %v322_v58 }
  0x74   :  { %347 = vst [vmem:[#allocation8 + $0x78] sm:$0xff] %v323_v63 }
  0x75   :  { %348 = vst [vmem:[#allocation8 + $0x80] sm:$0xff] %v324_v0 }
  0x76   :  { %349 = vst [vmem:[#allocation8 + $0x88] sm:$0xff] %v325_v11 }
  0x77   :  { %350 = vst [vmem:[#allocation8 + $0x90] sm:$0xff] %v326_v19 }
  0x78   :  { %351 = vst [vmem:[#allocation8 + $0x98] sm:$0xff] %v327_v27 }
  0x79   :  { %352 = vst [vmem:[#allocation8 + $0xa0] sm:$0xff] %v328_v28 }
  0x7a   :  { %353 = vst [vmem:[#allocation8 + $0xa8] sm:$0xff] %v329_v60 }
  0x7b   :  { %354 = vst [vmem:[#allocation8 + $0xb0] sm:$0xff] %v330_v40 }
  0x7c   :  { %355 = vst [vmem:[#allocation8 + $0xb8] sm:$0xff] %v331_v41 }
  0x7d   :  { %368 = dma.vmem_to_hbm [thread:$0]  %s361_s5, 3072, %s363_s8, [#allocation4], %s489_s23, %s489_s23, %s490_s24  }
  0x7e   :  { %486 = dma.done.wait [#allocation4], 3072  }
  0x7f   :  { %487 = vsyncadd [#allocation4], 4294964224 }
  0x80   :  { %373 = vsyncpa [#allocation3], 1 }
  0x81   :  { %374 = vsyncpa [#allocation6], 1 }
  0x82   :  { %375 = vsyncpa [#allocation4], 1 }

</bundles_post_ra>
